<compile_context>
chip_gen: v7x
topology: tpu7x:2x2x1
jax: 0.10.0
libtpu: 0.0.40
codegen_flags: <defaults>
</compile_context>

<pallas_src>
import jax
import jax.numpy as jnp
from jax.experimental import pallas as pl
from jax.experimental.pallas import tpu as pltpu


def _pid_q_kernel(obs_t_ref, act_t_ref, w1a_t_ref, w1b_t_ref, b1_ref,
                  w2_t_ref, b2_ref, w3_t_ref, b3_ref, out_ref):
    # Layer 1 (fused concat): (H1, obs_dim)@(obs_dim, TB) + (H1, act_dim)@(act_dim, TB).
    h1t = (jnp.dot(w1a_t_ref[...], obs_t_ref[...], preferred_element_type=jnp.float32)
           + jnp.dot(w1b_t_ref[...], act_t_ref[...], preferred_element_type=jnp.float32)
           + b1_ref[...])                                   # (H1, TB); bias column broadcasts on lanes
    h1t = jnp.maximum(h1t, 0.0)                             # f32 elementwise (v5e-safe)

    # Layer 2: (H2, H1) @ (H1, TB) -> (H2, TB); bias + ReLU in f32.
    h2t = jnp.dot(w2_t_ref[...], h1t.astype(w2_t_ref.dtype),
                  preferred_element_type=jnp.float32) + b2_ref[...]
    h2t = jnp.maximum(h2t, 0.0)

    # Output layer (N=1): (1, H2) @ (H2, TB) on the MXU -> lane-dense (1, TB) result.
    qt = jnp.dot(w3_t_ref[...], h2t.astype(w3_t_ref.dtype),
                 preferred_element_type=jnp.float32) + b3_ref[0]
    out_ref[...] = qt.astype(out_ref.dtype)                 # straight unmasked store


def pid_q_function(obs, act, params, *, batch_tile=1024, use_bf16=True):
    """Fused MLP Q-function. obs: (B, obs_dim), act: (B, act_dim). Returns (B,)."""
    w1, b1, w2, b2, w3, b3 = params
    B, obs_dim = obs.shape
    act_dim = act.shape[1]
    h1_dim = w1.shape[1]
    h2_dim = w2.shape[1]

    mx_dtype = jnp.bfloat16 if use_bf16 else jnp.float32

    # Feature-major activations: batch on the 128-lane axis. Transpose + dtype cast
    # fuse into one XLA pass over the (16-feature-wide) activations.
    obs_t = obs.T.astype(mx_dtype)                          # (obs_dim, B)
    act_t = act.T.astype(mx_dtype)                          # (act_dim, B)

    # Fuse the concat into layer 1: split W1 along its input axis, store transposed.
    w1a_t = w1[:obs_dim].T.astype(mx_dtype)                 # (H1, obs_dim)
    w1b_t = w1[obs_dim:].T.astype(mx_dtype)                 # (H1, act_dim)
    w2_t = w2.T.astype(mx_dtype)                            # (H2, H1)
    w3_t = w3.T.astype(mx_dtype)                            # (1, H2)
    b1_c = jnp.reshape(b1, (h1_dim, 1)).astype(jnp.float32)
    b2_c = jnp.reshape(b2, (h2_dim, 1)).astype(jnp.float32)
    b3_s = jnp.reshape(b3, (-1,)).astype(jnp.float32)       # scalar -> SMEM

    # Big tiles amortize per-step overhead; cap so B >= 256 still gives >= 2 parallel
    # steps (v7x has 2 TensorCores; harmless on v5e/v6e).
    batch_tile = int(min(batch_tile, max(128, 128 * pl.cdiv(pl.cdiv(B, 2), 128))))
    num_tiles = pl.cdiv(B, batch_tile)
    b_padded = num_tiles * batch_tile
    # No jnp.pad: the trailing (ragged) block reads past B; those lanes yield garbage q
    # values that cannot affect valid columns and are sliced off below.

    q_rows = pl.pallas_call(
        _pid_q_kernel,
        out_shape=jax.ShapeDtypeStruct((1, b_padded), jnp.float32),
        grid_spec=pltpu.PrefetchScalarGridSpec(
            num_scalar_prefetch=0,
            grid=(num_tiles,),
            in_specs=[
                pl.BlockSpec((obs_dim, batch_tile), lambda i: (0, i)),   # obs^T tile
                pl.BlockSpec((act_dim, batch_tile), lambda i: (0, i)),   # act^T tile
                pl.BlockSpec((h1_dim, obs_dim), lambda i: (0, 0)),       # W1[:obs]^T
                pl.BlockSpec((h1_dim, act_dim), lambda i: (0, 0)),       # W1[obs:]^T
                pl.BlockSpec((h1_dim, 1), lambda i: (0, 0)),             # b1 column
                pl.BlockSpec((h2_dim, h1_dim), lambda i: (0, 0)),        # W2^T
                pl.BlockSpec((h2_dim, 1), lambda i: (0, 0)),             # b2 column
                pl.BlockSpec((1, h2_dim), lambda i: (0, 0)),             # W3^T row
                pl.BlockSpec(memory_space=pltpu.MemorySpace.SMEM),       # b3 scalar
            ],
            out_specs=pl.BlockSpec((1, batch_tile), lambda i: (0, i)),
        ),
        compiler_params=pltpu.CompilerParams(
            dimension_semantics=("parallel",),
        ),
    )(obs_t, act_t, w1a_t, w1b_t, b1_c, w2_t, b2_c, w3_t, b3_s)

    return q_rows.reshape(b_padded)[:B]                     # flatten + drop ragged tail


def init_params(key, obs_dim, act_dim, hidden_sizes):
    """Deterministic init. Weights stored as (in_features, out_features), f32."""
    sizes = [obs_dim + act_dim] + list(hidden_sizes) + [1]
    params = []
    for j in range(len(sizes) - 1):
        key, kw, kb = jax.random.split(key, 3)
        bound = 1.0 / jnp.sqrt(sizes[j])   # matches torch.nn.Linear default init range
        w = jax.random.uniform(kw, (sizes[j], sizes[j + 1]),
                               minval=-bound, maxval=bound, dtype=jnp.float32)
        b = jax.random.uniform(kb, (1, sizes[j + 1]),
                               minval=-bound, maxval=bound, dtype=jnp.float32)
        params += [w, b]
    return tuple(params)


def _reference(obs, act, params):
    """Pure-JAX reference of the PyTorch forward pass (highest-precision matmuls)."""
    w1, b1, w2, b2, w3, b3 = params
    hp = jax.lax.Precision.HIGHEST
    x = jnp.concatenate([obs, act], axis=-1)
    h1 = jnp.maximum(jnp.dot(x, w1, precision=hp) + b1, 0.0)
    h2 = jnp.maximum(jnp.dot(h1, w2, precision=hp) + b2, 0.0)
    q = jnp.dot(h2, w3, precision=hp) + b3
    return jnp.squeeze(q, -1)


if __name__ == "__main__":
    obs_dim, act_dim = 12, 4
    hidden_sizes = (32, 32)
    batch = 300   # not a multiple of the tile -> exercises the ragged trailing block; grid = 2

    key = jax.random.PRNGKey(0)
    k_obs, k_act, k_params = jax.random.split(key, 3)

    obs = jax.random.normal(k_obs, (batch, obs_dim), dtype=jnp.float32)
    act = jax.random.normal(k_act, (batch, act_dim), dtype=jnp.float32)
    params = init_params(k_params, obs_dim, act_dim, hidden_sizes)

    q_ref = _reference(obs, act, params)

    # f32-operand path (tolerance allows for MXU multi-pass precision differences).
    q_f32 = jax.block_until_ready(pid_q_function(obs, act, params, use_bf16=False))
    assert q_f32.shape == (batch,)
    assert jnp.allclose(q_f32, q_ref, atol=2e-2, rtol=2e-2), "f32 mismatch vs reference"

    # bf16-operand path (default fast path; f32 accumulation on the MXU).
    q_bf16 = jax.block_until_ready(pid_q_function(obs, act, params, use_bf16=True))
    assert q_bf16.shape == (batch,)
    assert jnp.allclose(q_bf16, q_ref, atol=1e-1, rtol=1e-1), "bf16 mismatch vs reference"

    print("KERNEL_OK")
</pallas_src>

<mosaic_0001>
module attributes {stable_mosaic.version = 11 : i64} {
  func.func @_pid_q_kernel(%arg0: i32, %arg1: memref<12x256xf32, #tpu.memory_space<vmem>>, %arg2: memref<4x256xf32, #tpu.memory_space<vmem>>, %arg3: memref<32x12xf32, #tpu.memory_space<vmem>>, %arg4: memref<32x4xf32, #tpu.memory_space<vmem>>, %arg5: memref<32x1xf32, #tpu.memory_space<vmem>>, %arg6: memref<32x32xf32, #tpu.memory_space<vmem>>, %arg7: memref<32x1xf32, #tpu.memory_space<vmem>>, %arg8: memref<1x32xf32, #tpu.memory_space<vmem>>, %arg9: memref<1xf32, #tpu.memory_space<smem>>, %arg10: memref<1x256xf32, #tpu.memory_space<vmem>>) attributes {dimension_semantics = [#tpu.dimension_semantics<parallel>], iteration_bounds = array<i64: 2>, scalar_prefetch = 0 : i64, scratch_operands = 0 : i64, tpu.core_type = #tpu.core_type<tc>, window_params = [{transform_indices = @transform_0, window_bounds = array<i64: 12, 256>}, {transform_indices = @transform_1, window_bounds = array<i64: 4, 256>}, {pipeline_mode = #tpu.pipeline_mode<synchronous>, transform_indices = @transform_2, window_bounds = array<i64: 32, 12>}, {pipeline_mode = #tpu.pipeline_mode<synchronous>, transform_indices = @transform_3, window_bounds = array<i64: 32, 4>}, {pipeline_mode = #tpu.pipeline_mode<synchronous>, transform_indices = @transform_4, window_bounds = array<i64: 32, 1>}, {pipeline_mode = #tpu.pipeline_mode<synchronous>, transform_indices = @transform_5, window_bounds = array<i64: 32, 32>}, {pipeline_mode = #tpu.pipeline_mode<synchronous>, transform_indices = @transform_6, window_bounds = array<i64: 32, 1>}, {pipeline_mode = #tpu.pipeline_mode<synchronous>, transform_indices = @transform_7, window_bounds = array<i64: 1, 32>}, {transform_indices = @transform_8, window_bounds = array<i64: 1>}, {transform_indices = @transform_9, window_bounds = array<i64: 1, 256>}]} {
    %c0 = arith.constant 0 : index
    %c0_0 = arith.constant 0 : index
    %0 = vector.load %arg3[%c0, %c0_0] : memref<32x12xf32, #tpu.memory_space<vmem>>, vector<32x12xf32>
    %c0_1 = arith.constant 0 : index
    %c0_2 = arith.constant 0 : index
    %1 = vector.load %arg1[%c0_1, %c0_2] : memref<12x256xf32, #tpu.memory_space<vmem>>, vector<12x256xf32>
    %cst = arith.constant dense<0.000000e+00> : vector<32x256xf32>
    %2 = tpu.matmul %0, %1, %cst {dimension_numbers = #tpu.dot_dimension_numbers<[1], [0], [0], [1], [0, 0, 1, 1], [], []>} : vector<32x12xf32>, vector<12x256xf32>, vector<32x256xf32> -> vector<32x256xf32>
    %c0_3 = arith.constant 0 : index
    %c0_4 = arith.constant 0 : index
    %3 = vector.load %arg4[%c0_3, %c0_4] : memref<32x4xf32, #tpu.memory_space<vmem>>, vector<32x4xf32>
    %c0_5 = arith.constant 0 : index
    %c0_6 = arith.constant 0 : index
    %4 = vector.load %arg2[%c0_5, %c0_6] : memref<4x256xf32, #tpu.memory_space<vmem>>, vector<4x256xf32>
    %cst_7 = arith.constant dense<0.000000e+00> : vector<32x256xf32>
    %5 = tpu.matmul %3, %4, %cst_7 {dimension_numbers = #tpu.dot_dimension_numbers<[1], [0], [0], [1], [0, 0, 1, 1], [], []>} : vector<32x4xf32>, vector<4x256xf32>, vector<32x256xf32> -> vector<32x256xf32>
    %6 = arith.addf %2, %5 : vector<32x256xf32>
    %c0_8 = arith.constant 0 : index
    %c0_9 = arith.constant 0 : index
    %7 = vector.load %arg5[%c0_8, %c0_9] : memref<32x1xf32, #tpu.memory_space<vmem>>, vector<32x1xf32>
    %8 = vector.broadcast %7 : vector<32x1xf32> to vector<32x256xf32>
    %9 = arith.addf %6, %8 : vector<32x256xf32>
    %cst_10 = arith.constant 0.000000e+00 : f32
    %10 = vector.broadcast %cst_10 : f32 to vector<32x256xf32>
    %11 = arith.maximumf %9, %10 : vector<32x256xf32>
    %c0_11 = arith.constant 0 : index
    %c0_12 = arith.constant 0 : index
    %12 = vector.load %arg6[%c0_11, %c0_12] : memref<32x32xf32, #tpu.memory_space<vmem>>, vector<32x32xf32>
    %cst_13 = arith.constant dense<0.000000e+00> : vector<32x256xf32>
    %13 = tpu.matmul %12, %11, %cst_13 {dimension_numbers = #tpu.dot_dimension_numbers<[1], [0], [0], [1], [0, 0, 1, 1], [], []>} : vector<32x32xf32>, vector<32x256xf32>, vector<32x256xf32> -> vector<32x256xf32>
    %c0_14 = arith.constant 0 : index
    %c0_15 = arith.constant 0 : index
    %14 = vector.load %arg7[%c0_14, %c0_15] : memref<32x1xf32, #tpu.memory_space<vmem>>, vector<32x1xf32>
    %15 = vector.broadcast %14 : vector<32x1xf32> to vector<32x256xf32>
    %16 = arith.addf %13, %15 : vector<32x256xf32>
    %cst_16 = arith.constant 0.000000e+00 : f32
    %17 = vector.broadcast %cst_16 : f32 to vector<32x256xf32>
    %18 = arith.maximumf %16, %17 : vector<32x256xf32>
    %c0_17 = arith.constant 0 : index
    %c0_18 = arith.constant 0 : index
    %19 = vector.load %arg8[%c0_17, %c0_18] : memref<1x32xf32, #tpu.memory_space<vmem>>, vector<1x32xf32>
    %cst_19 = arith.constant dense<0.000000e+00> : vector<1x256xf32>
    %20 = tpu.matmul %19, %18, %cst_19 {dimension_numbers = #tpu.dot_dimension_numbers<[1], [0], [0], [1], [0, 0, 1, 1], [], []>} : vector<1x32xf32>, vector<32x256xf32>, vector<1x256xf32> -> vector<1x256xf32>
    %c0_20 = arith.constant 0 : index
    %21 = memref.load %arg9[%c0_20] : memref<1xf32, #tpu.memory_space<smem>>
    %22 = vector.broadcast %21 : f32 to vector<1x256xf32>
    %23 = arith.addf %20, %22 : vector<1x256xf32>
    %c0_21 = arith.constant 0 : index
    %c0_22 = arith.constant 0 : index
    %24 = vector.load %arg10[%c0_21, %c0_22] : memref<1x256xf32, #tpu.memory_space<vmem>>, vector<1x256xf32>
    tpu.vector_store %arg10[%c0_21, %c0_22], %23 {strides = array<i32>} : memref<1x256xf32, #tpu.memory_space<vmem>>, vector<1x256xf32>,
    return
  }
  func.func @transform_0(%arg0: i32) -> (i32, i32) {
    %c0_i32 = arith.constant 0 : i32
    %c0_i32_0 = arith.constant 0 : i32
    return %c0_i32, %arg0 : i32, i32
  }
  func.func @transform_1(%arg0: i32) -> (i32, i32) {
    %c0_i32 = arith.constant 0 : i32
    %c0_i32_0 = arith.constant 0 : i32
    return %c0_i32, %arg0 : i32, i32
  }
  func.func @transform_2(%arg0: i32) -> (i32, i32) {
    %c0_i32 = arith.constant 0 : i32
    %c0_i32_0 = arith.constant 0 : i32
    %c0_i32_1 = arith.constant 0 : i32
    return %c0_i32, %c0_i32_0 : i32, i32
  }
  func.func @transform_3(%arg0: i32) -> (i32, i32) {
    %c0_i32 = arith.constant 0 : i32
    %c0_i32_0 = arith.constant 0 : i32
    %c0_i32_1 = arith.constant 0 : i32
    return %c0_i32, %c0_i32_0 : i32, i32
  }
  func.func @transform_4(%arg0: i32) -> (i32, i32) {
    %c0_i32 = arith.constant 0 : i32
    %c0_i32_0 = arith.constant 0 : i32
    %c0_i32_1 = arith.constant 0 : i32
    return %c0_i32, %c0_i32_0 : i32, i32
  }
  func.func @transform_5(%arg0: i32) -> (i32, i32) {
    %c0_i32 = arith.constant 0 : i32
    %c0_i32_0 = arith.constant 0 : i32
    %c0_i32_1 = arith.constant 0 : i32
    return %c0_i32, %c0_i32_0 : i32, i32
  }
  func.func @transform_6(%arg0: i32) -> (i32, i32) {
    %c0_i32 = arith.constant 0 : i32
    %c0_i32_0 = arith.constant 0 : i32
    %c0_i32_1 = arith.constant 0 : i32
    return %c0_i32, %c0_i32_0 : i32, i32
  }
  func.func @transform_7(%arg0: i32) -> (i32, i32) {
    %c0_i32 = arith.constant 0 : i32
    %c0_i32_0 = arith.constant 0 : i32
    %c0_i32_1 = arith.constant 0 : i32
    return %c0_i32, %c0_i32_0 : i32, i32
  }
  func.func @transform_8(%arg0: i32) -> i32 {
    %c0_i32 = arith.constant 0 : i32
    %c0_i32_0 = arith.constant 0 : i32
    return %c0_i32 : i32
  }
  func.func @transform_9(%arg0: i32) -> (i32, i32) {
    %c0_i32 = arith.constant 0 : i32
    %c0_i32_0 = arith.constant 0 : i32
    return %c0_i32, %arg0 : i32, i32
  }
}

</mosaic_0001>

<bundles_post_ra>
// kernel: tpu_custom_call.1
= control target key start
LH: loop header
LB: loop body
LE: loop exit
PB: predicated region body
PF: predicated region fallthrough
CT: control target
= control target key end

     0   :  { %s2489_s0 = inlined_call_operand.vmem [shape: f32[12,300], index: 0, kind: input, shape index: {}]   ;;  %s2490_s1 = inlined_call_operand.vmem [shape: f32[4,300], index: 1, kind: input, shape index: {}]   ;;  %s2491_s2 = inlined_call_operand.vmem [shape: f32[32,12], index: 2, kind: input, shape index: {}]   ;;  %s2492_s3 = inlined_call_operand.vmem [shape: f32[32,4], index: 3, kind: input, shape index: {}]   ;;  %s2493_s4 = inlined_call_operand.vmem [shape: f32[32,1], index: 4, kind: input, shape index: {}]   ;;  %s2494_s5 = inlined_call_operand.vmem [shape: f32[32,32], index: 5, kind: input, shape index: {}]   ;;  %s2495_s6 = inlined_call_operand.vmem [shape: f32[32,1], index: 6, kind: input, shape index: {}]   ;;  %s2496_s7 = inlined_call_operand.vmem [shape: f32[1,32], index: 7, kind: input, shape index: {}]   ;;  %s2497_s8 = inlined_call_operand.<no memory space> [shape: f32[1], index: 8, kind: input, shape index: {}]   ;;  %s2498_s9 = inlined_call_operand.hbm [shape: f32[1,512], index: 9, kind: output, shape index: {}]  }
   0x1   :  { %2504 = sst [smem:[#allocation12_spill]] %s2489_s0 }
   0x2   :  { %14 = sst [smem:[#allocation2]] %s2497_s8 }
   0x3   :  { %15 = vsyncpa [#allocation5], 0 }
   0x4   :  { %17 = vsyncpa [#allocation5 + $0x1], 0  ;;  %s2000_s11 = smov 0   ;;  %s2002_s12 = smov 0  }
   0x5   :  { %s2004_s13 = smov 0   ;;  %s2006_s14 = smov 0  }
   0x6 LB: > { %2505 = sst [smem:[#allocation7_spill]] %s1862_s11  ;;  %s2021_s8 = sadd.s32 4294967295, %s1874_s14   ;;  %s1874_s14 = sphi %s2006_s14, %s2525_s14   ;;  %s1870_s13 = sphi %s2004_s13, %s2527_s13   ;;  %s1866_s12 = sphi %s2002_s12, %s2529_s12   ;;  %s1862_s11 = sphi %s2000_s11, %s2528_s11  }
   0x7   : > { %2506 = sst [smem:[#allocation8_spill]] %s1870_s13  ;;  %s1479_s15 = sadd.s32 4294967294, %s1874_s14  }
   0x8   : > { %s2025_s16 = sadd.s32 1, %s1874_s14   ;;  %s30_s17 = sadd.s32 1, %s1870_s13 }
   0x9   : > { %2507 = sst [smem:[#allocation9_spill]] %s2025_s16  ;;  %s27_s18 = ssub.s32 %s1874_s14, %s2025_s16 }
   0xa   : > { %p37_p0 = scmp.ne.s32.totalorder %s1870_s13, %s1866_s12  ;;  %p28_p1 = scmp.eq.s32.totalorder %s27_s18, 0 }
   0xb   : > { %p38_p2 = scmp.eq.s32.totalorder %s1874_s14, 0  ;;  %p240_p3 = scmp.eq.s32.totalorder %s2021_s8, 1 }
   0xc   : > { %p245_p4 = scmp.ne.s32.totalorder %s1866_s12, %s1862_s11  ;;  %p246_p7 = scmp.eq.s32.totalorder %s1479_s15, 1 }
   0xd   : > { %s2037_s19 = scalar_select %p28_p1, %s1870_s13, %s30_s17  }
   0xe   : > { %p39_p5 = por %p38_p2, %p37_p0  ;;  %p2039_p6 = por %p240_p3, %p37_p0 }
   0xf   : > { %2508 = sst [smem:[#allocation10_spill]] %s2037_s19  ;;  %p2043_p8 = por %p246_p7, %p245_p4 }
  0x10   : > { %p1481_p9 = scmp.ge.s32.totalorder %s1874_s14, 2 }
  0x11   : > { %s2510_s21 = scalar_select %p2043_p8, 1, 0 }
  0x12   : > { %283 = sbr.rel (%p1481_p9) target bundleno = 169 (0xa9), region = 44 }
  0x13   : > { %2511 = sst [smem:[#allocation11_spill]] %s2510_s21 }
  0x19   : > { %286 = sbr.rel (!%p39_p5) target bundleno = 169 (0xa9), region = 48  ;;  %s288_s22 = sand.u32 (%p39_p5), 1, %s1870_s13  }
  0x1a   : > { %s1483_s23 = sshll.u32 (%p39_p5), %s1874_s14, 1  ;;  %s1482_s24 = sshll.u32 (%p39_p5), %s288_s22, 5 }
  0x1b   : > { %s292_s25 = ssub.s32 (%p39_p5), 3, %s1483_s23  ;;  %s1536_s26 = sshll.u32 (%p39_p5), %s1874_s14, 4 }
  0x1c   : > { %p293_p10 = scmp.lt.s32.totalorder (%p39_p5), %s292_s25, 2  ;;  %s2512_s0 = sld [smem:[#allocation12_spill]] (%p39_p5) }
  0x1d   : > { %s2060_s15 = scalar_lea.vmem (%p39_p5), [#allocation3], %s1482_s24  }
  0x20   : > { %s2531_s25 = smov (!%p293_p10, %s292_s25), 2 }
  0x21   : > { %s1484_s30 = sshll.u32 %s2531_s25, 8  ;;  %s2058_s10 = sshll.u32 %s2531_s25, 3 }
  0x22   : > { %s2056_s29 = scalar_lea.vmem %s2512_s0, %s1536_s26   ;;  %p1488_p11 = scmp.eq.s32.totalorder %s1484_s30, 0 }
  0x23   : > { %p303_p12 = scmp.lt.u32.totalorder (!%p1488_p11), %s2058_s10, 8 }
  0x24   : > { %302 = sbr.rel (%p1488_p11) target bundleno = 169 (0xa9), region = 52 }
  0x2b   : > { %306 = sbr.rel (%p303_p12) target bundleno = 160 (0xa0), region = 56  ;;  %s2064_s17 = sand.u32 (!%p303_p12), 7, %s2058_s10  }
  0x2c   : > { %p324_p13 = scmp.eq.s32.totalorder (!%p303_p12), %s2064_s17, 0  ;;  %p1489_p0 = scmp.ne.s32.totalorder (!%p303_p12), %s2064_s17, 0 }
  0x32   : > { %327 = sbr.rel (%p1489_p0) target bundleno = 103 (0x67), region = 71  ;;  %s328_s18 = sshrl.u32 (!%p1489_p0), %s2058_s10, 3 }
  0x33   : > { %s2071_s22 = sshrl.u32 (!%p1489_p0), %s328_s18, 5 }
  0x34   : > { %p1490_p1 = scmp.le.s32.totalorder (!%p1489_p0), %s2071_s22, 0 }
  0x39   : > { %1401 = sbr.rel (%p1490_p1) target bundleno = 83 (0x53), region = 177  ;;  %s2513_s23 = smov (!%p1490_p1), %s2060_s15 }
  0x3a   : > { %s2514_s24 = smov (!%p1490_p1), %s2056_s29  ;;  %s2080_s25 = smov (!%p1490_p1), 0  }
  0x3b   : > { %s2082_s26 = smov (!%p1490_p1), 0  }
  0x40 LB: >> { %v347_v0 = vld [vmem:[%s1882_s24 + $0x18] sm:$0xff]  ;;  %v349_v1 = vld [vmem:[%s1882_s24 + $0x20] sm:$0xff]  ;;  %v351_v2 = vld [vmem:[%s1882_s24 + $0x28] sm:$0xff]  ;;  %s469_s27 = sadd.s32 1, %s1886_s25  ;;  %s335_s26 = sadd.s32 1, %s1890_s26   ;;  %s1890_s26 = sphi %s2082_s26, %s335_s26   ;;  %s1886_s25 = sphi %s2080_s25, %s2517_s25   ;;  %s1882_s24 = sphi %s2514_s24, %s2516_s24   ;;  %s1878_s23 = sphi %s2513_s23, %s2515_s23  }
  0x41   : >> { %v353_v3 = vld [vmem:[%s1882_s24 + $0x30] sm:$0xff]  ;;  %v355_v4 = vld [vmem:[%s1882_s24 + $0x38] sm:$0xff]  ;;  %v357_v5 = vld [vmem:[%s1882_s24 + $0x40] sm:$0xff]  ;;  %406 = vst [vmem:[%s1878_s23 + $0x10] sm:$0xff] %v347_v0  ;;  %p470_p2 = scmp.ge.s32.totalorder %s469_s27, %s2071_s22  ;;  %p334_p3 = scmp.ge.s32.totalorder %s335_s26, %s2071_s22 }
  0x42   : >> { %408 = vst [vmem:[%s1878_s23 + $0x18] sm:$0xff] %v349_v1  ;;  %410 = vst [vmem:[%s1878_s23 + $0x20] sm:$0xff] %v351_v2  ;;  %v359_v6 = vld [vmem:[%s1882_s24 + $0x48] sm:$0xff]  ;;  %v361_v7 = vld [vmem:[%s1882_s24 + $0x50] sm:$0xff] }
  0x43   : >> { %v363_v8 = vld [vmem:[%s1882_s24 + $0x58] sm:$0xff]  ;;  %412 = vst [vmem:[%s1878_s23 + $0x28] sm:$0xff] %v353_v3  ;;  %414 = vst [vmem:[%s1878_s23 + $0x30] sm:$0xff] %v355_v4  ;;  %v365_v9 = vld [vmem:[%s1882_s24 + $0x60] sm:$0xff]  ;;  %s2533_s27 = smov (%p470_p2, %s469_s27), 0 }
  0x44   : >> { %416 = vst [vmem:[%s1878_s23 + $0x38] sm:$0xff] %v357_v5  ;;  %v367_v10 = vld [vmem:[%s1882_s24 + $0x68] sm:$0xff]  ;;  %v369_v11 = vld [vmem:[%s1882_s24 + $0x70] sm:$0xff]  ;;  %418 = vst [vmem:[%s1878_s23 + $0x40] sm:$0xff] %v359_v6  ;;  %s1491_s28 = sshll.u32 %s2533_s27, 8 }
  0x45   : >> { %420 = vst [vmem:[%s1878_s23 + $0x48] sm:$0xff] %v361_v7  ;;  %422 = vst [vmem:[%s1878_s23 + $0x50] sm:$0xff] %v363_v8  ;;  %v371_v12 = vld [vmem:[%s1882_s24 + $0x78] sm:$0xff]  ;;  %v373_v13 = vld [vmem:[%s1882_s24 + $0x80] sm:$0xff]  ;;  %s474_s30 = scalar_lea.vmem %s2056_s29, %s1491_s28   ;;  %s475_s25 = scalar_lea.vmem %s2060_s15, %s1491_s28 [#allocation3]  }
  0x46   : >> { %v375_v14 = vld [vmem:[%s1882_s24 + $0x88] sm:$0xff]  ;;  %424 = vst [vmem:[%s1878_s23 + $0x58] sm:$0xff] %v365_v9  ;;  %426 = vst [vmem:[%s1878_s23 + $0x60] sm:$0xff] %v367_v10  ;;  %v377_v15 = vld [vmem:[%s1882_s24 + $0x90] sm:$0xff] }
  0x47   : >> { %428 = vst [vmem:[%s1878_s23 + $0x68] sm:$0xff] %v369_v11  ;;  %v379_v16 = vld [vmem:[%s1882_s24 + $0x98] sm:$0xff]  ;;  %v381_v17 = vld [vmem:[%s1882_s24 + $0xa0] sm:$0xff]  ;;  %430 = vst [vmem:[%s1878_s23 + $0x70] sm:$0xff] %v371_v12 }
  0x48   : >> { %432 = vst [vmem:[%s1878_s23 + $0x78] sm:$0xff] %v373_v13  ;;  %434 = vst [vmem:[%s1878_s23 + $0x80] sm:$0xff] %v375_v14  ;;  %v383_v18 = vld [vmem:[%s1882_s24 + $0xa8] sm:$0xff]  ;;  %v385_v19 = vld [vmem:[%s1882_s24 + $0xb0] sm:$0xff] }
  0x49   : >> { %v387_v20 = vld [vmem:[%s1882_s24 + $0xb8] sm:$0xff]  ;;  %436 = vst [vmem:[%s1878_s23 + $0x88] sm:$0xff] %v377_v15  ;;  %438 = vst [vmem:[%s1878_s23 + $0x90] sm:$0xff] %v379_v16  ;;  %v389_v21 = vld [vmem:[%s1882_s24 + $0xc0] sm:$0xff] }
  0x4a   : >> { %440 = vst [vmem:[%s1878_s23 + $0x98] sm:$0xff] %v381_v17  ;;  %v391_v22 = vld [vmem:[%s1882_s24 + $0xc8] sm:$0xff]  ;;  %v393_v23 = vld [vmem:[%s1882_s24 + $0xd0] sm:$0xff]  ;;  %442 = vst [vmem:[%s1878_s23 + $0xa0] sm:$0xff] %v383_v18 }
  0x4b   : >> { %444 = vst [vmem:[%s1878_s23 + $0xa8] sm:$0xff] %v385_v19  ;;  %446 = vst [vmem:[%s1878_s23 + $0xb0] sm:$0xff] %v387_v20  ;;  %v395_v24 = vld [vmem:[%s1882_s24 + $0xd8] sm:$0xff]  ;;  %v397_v25 = vld [vmem:[%s1882_s24 + $0xe0] sm:$0xff] }
  0x4c   : >> { %v399_v26 = vld [vmem:[%s1882_s24 + $0xe8] sm:$0xff]  ;;  %448 = vst [vmem:[%s1878_s23 + $0xb8] sm:$0xff] %v389_v21  ;;  %450 = vst [vmem:[%s1878_s23 + $0xc0] sm:$0xff] %v391_v22  ;;  %v401_v27 = vld [vmem:[%s1882_s24 + $0xf0] sm:$0xff]  ;;  %337 = sbr.rel (!%p334_p3) target bundleno = 64 (0x40), region = 183 }
  0x4d   : >> { %452 = vst [vmem:[%s1878_s23 + $0xc8] sm:$0xff] %v393_v23  ;;  %v403_v28 = vld [vmem:[%s1882_s24 + $0xf8] sm:$0xff]  ;;  %v341_v29 = vld [vmem:[%s1882_s24] sm:$0xff]  ;;  %454 = vst [vmem:[%s1878_s23 + $0xd0] sm:$0xff] %v395_v24 }
  0x4e   : >> { %456 = vst [vmem:[%s1878_s23 + $0xd8] sm:$0xff] %v397_v25  ;;  %458 = vst [vmem:[%s1878_s23 + $0xe0] sm:$0xff] %v399_v26  ;;  %v343_v30 = vld [vmem:[%s1882_s24 + $0x8] sm:$0xff]  ;;  %v463_v31 = vld [vmem:[%s1882_s24 + $0x100] sm:$0xff] }
  0x4f   : >> { %342 = vst [vmem:[%s1878_s23] sm:$0xff] %v341_v29  ;;  %460 = vst [vmem:[%s1878_s23 + $0xe8] sm:$0xff] %v401_v27  ;;  %v465_v32 = vld [vmem:[%s1882_s24 + $0x108] sm:$0xff]  ;;  %v467_v33 = vld [vmem:[%s1882_s24 + $0x110] sm:$0xff]  ;;  %s2516_s24 = smov %s474_s30 }
  0x50   : >> { %462 = vst [vmem:[%s1878_s23 + $0xf0] sm:$0xff] %v403_v28  ;;  %344 = vst [vmem:[%s1878_s23 + $0x8] sm:$0xff] %v343_v30 }
  0x51   : >> { %464 = vst [vmem:[%s1878_s23 + $0xf8] sm:$0xff] %v463_v31  ;;  %466 = vst [vmem:[%s1878_s23 + $0x100] sm:$0xff] %v465_v32 }
  0x52   : >> { %468 = vst [vmem:[%s1878_s23 + $0x108] sm:$0xff] %v467_v33  ;;  %s2515_s23 = smov %s475_s25  ;;  %s2517_s25 = smov %s2533_s27 }
  0x53 PF: > { %s2184_s28 = sand.u32 31, %s328_s18   ;;  %s1537_s0 = sshll.u32 %s2071_s22, 12 }
  0x54   : > { %s480_s19 = sshra.s32 %s1537_s0, 4  ;;  %p1496_p4 = scmp.le.s32.totalorder %s2184_s28, 0 }
  0x55   : > { %s2188_s13 = scalar_lea.vmem %s2056_s29, %s480_s19   ;;  %s484_s16 = scalar_lea.vmem %s2060_s15, %s480_s19 [#allocation3]  }
  0x56   : > { %1415 = sbr.rel (%p1496_p4) target bundleno = 103 (0x67), region = 188  ;;  %s1892_s27 = smov (!%p1496_p4), %s484_s16  }
  0x57   : > { %s1896_s26 = smov (!%p1496_p4), %s2188_s13   ;;  %s1900_s30 = smov (!%p1496_p4), 0  }
  0x58   : > { %s1904_s23 = smov (!%p1496_p4), 0  }
  0x5d LB: >> { %v496_v34 = vld [vmem:[%s1898_s26] sm:$0xff]  ;;  %v498_v35 = vld [vmem:[%s1898_s26 + $0x18] sm:$0xff]  ;;  %s500_s0 = sadd.s32 1, %s1902_s30  ;;  %s490_s23 = sadd.s32 1, %s1906_s23   ;;  %s1906_s23 = sphi %s1904_s23, %s490_s23   ;;  %s1902_s30 = sphi %s1900_s30, %s1901_s30   ;;  %s1898_s26 = sphi %s1896_s26, %s505_s26   ;;  %s1894_s27 = sphi %s1892_s27, %s506_s27  }
  0x5e   : >> { %497 = vst [vmem:[%s1894_s27] sm:$0xff] %v496_v34  ;;  %499 = vst [vmem:[%s1894_s27 + $0x10] sm:$0xff] %v498_v35  ;;  %p501_p5 = scmp.ge.s32.totalorder %s500_s0, %s2184_s28  ;;  %p489_p7 = scmp.ge.s32.totalorder %s490_s23, %s2184_s28 }
  0x60   : >> { %s2535_s0 = smov (%p501_p5, %s500_s0), 0  ;;  %492 = sbr.rel (!%p489_p7) target bundleno = 93 (0x5d), region = 194 }
  0x61   : >> { %s1497_s19 = sshll.u32 %s2535_s0, 3  ;;  %s1901_s30 = smov %s2535_s0  }
  0x62   : >> { %s505_s26 = scalar_lea.vmem %s2188_s13, %s1497_s19   ;;  %s506_s27 = scalar_lea.vmem %s484_s16, %s1497_s19 [#allocation3]  }
  0x67 PF: > { %509 = sbr.rel (%p324_p13) target bundleno = 160 (0xa0), region = 89  ;;  %s511_s18 = ssub.s32 (!%p324_p13), %s2058_s10, %s2064_s17 }
  0x68   : > { %s515_s22 = sshrl.u32 (!%p324_p13), %s2058_s10, 3  ;;  %s2202_s24 = scalar_lea.vmem (!%p324_p13), %s2056_s29, %s511_s18 }
  0x69   : > { %s2205_s25 = scalar_lea.vmem (!%p324_p13), %s2060_s15, %s511_s18 [#allocation3]  ;;  %s2209_s27 = sshrl.u32 (!%p324_p13), %s515_s22, 5 }
  0x6a   : > { %p1499_p10 = scmp.le.s32.totalorder (!%p324_p13), %s2209_s27, 0 }
  0x6e   : > { %1429 = sbr.rel (%p1499_p10) target bundleno = 136 (0x88), region = 199  ;;  %s2518_s13 = smov (!%p1499_p10), %s2060_s15 }
  0x6f   : > { %s2519_s16 = smov (!%p1499_p10), %s2056_s29  ;;  %s2218_s28 = smov (!%p1499_p10), 0  }
  0x70   : > { %s2220_s26 = smov (!%p1499_p10), 0  }
  0x75 LB: >> { %v534_v36 = vld [vmem:[%s1914_s16 + $0x18] sm:$0xff]  ;;  %v536_v37 = vld [vmem:[%s1914_s16 + $0x20] sm:$0xff]  ;;  %v538_v38 = vld [vmem:[%s1914_s16 + $0x28] sm:$0xff]  ;;  %s656_s30 = sadd.s32 1, %s1918_s28  ;;  %s522_s26 = sadd.s32 1, %s1922_s26   ;;  %s1922_s26 = sphi %s2220_s26, %s522_s26   ;;  %s1918_s28 = sphi %s2218_s28, %s2522_s28   ;;  %s1914_s16 = sphi %s2519_s16, %s2521_s16   ;;  %s1910_s13 = sphi %s2518_s13, %s2520_s13  }
  0x76   : >> { %v540_v39 = vld [vmem:[%s1914_s16 + $0x30] sm:$0xff]  ;;  %v542_v40 = vld [vmem:[%s1914_s16 + $0x38] sm:$0xff]  ;;  %v544_v41 = vld [vmem:[%s1914_s16 + $0x40] sm:$0xff]  ;;  %593 = vst [vmem:[%s1910_s13 + $0x10] sm:$0xff] %v534_v36  ;;  %p657_p11 = scmp.ge.s32.totalorder %s656_s30, %s2209_s27  ;;  %p521_p12 = scmp.ge.s32.totalorder %s522_s26, %s2209_s27 }
  0x77   : >> { %595 = vst [vmem:[%s1910_s13 + $0x18] sm:$0xff] %v536_v37  ;;  %597 = vst [vmem:[%s1910_s13 + $0x20] sm:$0xff] %v538_v38  ;;  %v546_v42 = vld [vmem:[%s1914_s16 + $0x48] sm:$0xff]  ;;  %v548_v43 = vld [vmem:[%s1914_s16 + $0x50] sm:$0xff] }
  0x78   : >> { %v550_v44 = vld [vmem:[%s1914_s16 + $0x58] sm:$0xff]  ;;  %599 = vst [vmem:[%s1910_s13 + $0x28] sm:$0xff] %v540_v39  ;;  %601 = vst [vmem:[%s1910_s13 + $0x30] sm:$0xff] %v542_v40  ;;  %v552_v45 = vld [vmem:[%s1914_s16 + $0x60] sm:$0xff]  ;;  %s2537_s30 = smov (%p657_p11, %s656_s30), 0 }
  0x79   : >> { %603 = vst [vmem:[%s1910_s13 + $0x38] sm:$0xff] %v544_v41  ;;  %v554_v46 = vld [vmem:[%s1914_s16 + $0x68] sm:$0xff]  ;;  %v556_v47 = vld [vmem:[%s1914_s16 + $0x70] sm:$0xff]  ;;  %605 = vst [vmem:[%s1910_s13 + $0x40] sm:$0xff] %v546_v42  ;;  %s1500_s23 = sshll.u32 %s2537_s30, 8  ;;  %s2522_s28 = smov %s2537_s30 }
  0x7a   : >> { %607 = vst [vmem:[%s1910_s13 + $0x48] sm:$0xff] %v548_v43  ;;  %609 = vst [vmem:[%s1910_s13 + $0x50] sm:$0xff] %v550_v44  ;;  %v558_v48 = vld [vmem:[%s1914_s16 + $0x78] sm:$0xff]  ;;  %v560_v49 = vld [vmem:[%s1914_s16 + $0x80] sm:$0xff]  ;;  %s661_s0 = scalar_lea.vmem %s2056_s29, %s1500_s23   ;;  %s662_s19 = scalar_lea.vmem %s2060_s15, %s1500_s23 [#allocation3]  }
  0x7b   : >> { %v562_v50 = vld [vmem:[%s1914_s16 + $0x88] sm:$0xff]  ;;  %611 = vst [vmem:[%s1910_s13 + $0x58] sm:$0xff] %v552_v45  ;;  %613 = vst [vmem:[%s1910_s13 + $0x60] sm:$0xff] %v554_v46  ;;  %v564_v51 = vld [vmem:[%s1914_s16 + $0x90] sm:$0xff] }
  0x7c   : >> { %615 = vst [vmem:[%s1910_s13 + $0x68] sm:$0xff] %v556_v47  ;;  %v566_v52 = vld [vmem:[%s1914_s16 + $0x98] sm:$0xff]  ;;  %v568_v53 = vld [vmem:[%s1914_s16 + $0xa0] sm:$0xff]  ;;  %617 = vst [vmem:[%s1910_s13 + $0x70] sm:$0xff] %v558_v48 }
  0x7d   : >> { %619 = vst [vmem:[%s1910_s13 + $0x78] sm:$0xff] %v560_v49  ;;  %621 = vst [vmem:[%s1910_s13 + $0x80] sm:$0xff] %v562_v50  ;;  %v570_v54 = vld [vmem:[%s1914_s16 + $0xa8] sm:$0xff]  ;;  %v572_v55 = vld [vmem:[%s1914_s16 + $0xb0] sm:$0xff] }
  0x7e   : >> { %v574_v56 = vld [vmem:[%s1914_s16 + $0xb8] sm:$0xff]  ;;  %623 = vst [vmem:[%s1910_s13 + $0x88] sm:$0xff] %v564_v51  ;;  %625 = vst [vmem:[%s1910_s13 + $0x90] sm:$0xff] %v566_v52  ;;  %v576_v57 = vld [vmem:[%s1914_s16 + $0xc0] sm:$0xff] }
  0x7f   : >> { %627 = vst [vmem:[%s1910_s13 + $0x98] sm:$0xff] %v568_v53  ;;  %v578_v58 = vld [vmem:[%s1914_s16 + $0xc8] sm:$0xff]  ;;  %v580_v59 = vld [vmem:[%s1914_s16 + $0xd0] sm:$0xff]  ;;  %629 = vst [vmem:[%s1910_s13 + $0xa0] sm:$0xff] %v570_v54 }
  0x80   : >> { %631 = vst [vmem:[%s1910_s13 + $0xa8] sm:$0xff] %v572_v55  ;;  %633 = vst [vmem:[%s1910_s13 + $0xb0] sm:$0xff] %v574_v56  ;;  %v582_v60 = vld [vmem:[%s1914_s16 + $0xd8] sm:$0xff]  ;;  %v584_v61 = vld [vmem:[%s1914_s16 + $0xe0] sm:$0xff] }
  0x81   : >> { %v586_v62 = vld [vmem:[%s1914_s16 + $0xe8] sm:$0xff]  ;;  %635 = vst [vmem:[%s1910_s13 + $0xb8] sm:$0xff] %v576_v57  ;;  %637 = vst [vmem:[%s1910_s13 + $0xc0] sm:$0xff] %v578_v58  ;;  %v588_v63 = vld [vmem:[%s1914_s16 + $0xf0] sm:$0xff]  ;;  %524 = sbr.rel (!%p521_p12) target bundleno = 117 (0x75), region = 205 }
  0x82   : >> { %639 = vst [vmem:[%s1910_s13 + $0xc8] sm:$0xff] %v580_v59  ;;  %v590_v0 = vld [vmem:[%s1914_s16 + $0xf8] sm:$0xff]  ;;  %v528_v1 = vld [vmem:[%s1914_s16] sm:$0xff]  ;;  %641 = vst [vmem:[%s1910_s13 + $0xd0] sm:$0xff] %v582_v60 }
  0x83   : >> { %643 = vst [vmem:[%s1910_s13 + $0xd8] sm:$0xff] %v584_v61  ;;  %645 = vst [vmem:[%s1910_s13 + $0xe0] sm:$0xff] %v586_v62  ;;  %v530_v2 = vld [vmem:[%s1914_s16 + $0x8] sm:$0xff]  ;;  %v650_v3 = vld [vmem:[%s1914_s16 + $0x100] sm:$0xff] }
  0x84   : >> { %529 = vst [vmem:[%s1910_s13] sm:$0xff] %v528_v1  ;;  %647 = vst [vmem:[%s1910_s13 + $0xe8] sm:$0xff] %v588_v63  ;;  %v652_v4 = vld [vmem:[%s1914_s16 + $0x108] sm:$0xff]  ;;  %v654_v5 = vld [vmem:[%s1914_s16 + $0x110] sm:$0xff]  ;;  %s2521_s16 = smov %s661_s0 }
  0x85   : >> { %649 = vst [vmem:[%s1910_s13 + $0xf0] sm:$0xff] %v590_v0  ;;  %531 = vst [vmem:[%s1910_s13 + $0x8] sm:$0xff] %v530_v2 }
  0x86   : >> { %651 = vst [vmem:[%s1910_s13 + $0xf8] sm:$0xff] %v650_v3  ;;  %653 = vst [vmem:[%s1910_s13 + $0x100] sm:$0xff] %v652_v4 }
  0x87   : >> { %655 = vst [vmem:[%s1910_s13 + $0x108] sm:$0xff] %v654_v5  ;;  %s2520_s13 = smov %s662_s19 }
  0x88 PF: > { %s2322_s18 = sand.u32 31, %s515_s22   ;;  %s1539_s23 = sshll.u32 %s2209_s27, 12 }
  0x89   : > { %s667_s21 = sshra.s32 %s1539_s23, 4  ;;  %p1505_p13 = scmp.le.s32.totalorder %s2322_s18, 0 }
  0x8a   : > { %s2326_s11 = scalar_lea.vmem %s2056_s29, %s667_s21   ;;  %s671_s19 = scalar_lea.vmem %s2060_s15, %s667_s21 [#allocation3]  }
  0x8b   : > { %1443 = sbr.rel (%p1505_p13) target bundleno = 156 (0x9c), region = 210  ;;  %s1924_s30 = smov (!%p1505_p13), %s671_s19  }
  0x8c   : > { %s1928_s26 = smov (!%p1505_p13), %s2326_s11   ;;  %s1932_s0 = smov (!%p1505_p13), 0  }
  0x8d   : > { %s1936_s13 = smov (!%p1505_p13), 0  }
  0x92 LB: >> { %v683_v6 = vld [vmem:[%s1930_s26] sm:$0xff]  ;;  %v685_v7 = vld [vmem:[%s1930_s26 + $0x18] sm:$0xff]  ;;  %s687_s22 = sadd.s32 1, %s1934_s0  ;;  %s677_s13 = sadd.s32 1, %s1938_s13   ;;  %s1938_s13 = sphi %s1936_s13, %s677_s13   ;;  %s1934_s0 = sphi %s1932_s0, %s1933_s0   ;;  %s1930_s26 = sphi %s1928_s26, %s692_s26   ;;  %s1926_s30 = sphi %s1924_s30, %s693_s30  }
  0x93   : >> { %684 = vst [vmem:[%s1926_s30] sm:$0xff] %v683_v6  ;;  %686 = vst [vmem:[%s1926_s30 + $0x10] sm:$0xff] %v685_v7  ;;  %p688_p0 = scmp.ge.s32.totalorder %s687_s22, %s2322_s18  ;;  %p676_p1 = scmp.ge.s32.totalorder %s677_s13, %s2322_s18 }
  0x95   : >> { %s2539_s22 = smov (%p688_p0, %s687_s22), 0  ;;  %679 = sbr.rel (!%p676_p1) target bundleno = 146 (0x92), region = 216 }
  0x96   : >> { %s1506_s21 = sshll.u32 %s2539_s22, 3  ;;  %s1933_s0 = smov %s2539_s22  }
  0x97   : >> { %s692_s26 = scalar_lea.vmem %s2326_s11, %s1506_s21   ;;  %s693_s30 = scalar_lea.vmem %s671_s19, %s1506_s21 [#allocation3]  }
  0x9c PF: > { %s1940_s27 = smov 0  }
  0x9d   : > { %s694_s16 = sshllo.u32 %s1940_s27, %s2064_s17 }
  0x9e   : > { %v703_v8 = vld [vmem:[%s2202_s24] sm:%s694_s16]  ;;  %v705_v9 = vld [vmem:[%s2202_s24 + $0x18] sm:%s694_s16] }
  0x9f   : > { %704 = vst [vmem:[%s2205_s25] sm:%s694_s16] %v703_v8  ;;  %706 = vst [vmem:[%s2205_s25 + $0x10] sm:%s694_s16] %v705_v9 }
  0xa0 PF: > { %p1508_p2 = scmp.ge.u32.totalorder %s2058_s10, 8 }
  0xa1   : > { %s1941_s28 = smov (!%p1508_p2), 0  }
  0xa2   : > { %309 = sbr.rel (%p1508_p2) target bundleno = 169 (0xa9), region = 60  ;;  %s310_s11 = sshllo.u32 (!%p1508_p2), %s1941_s28, %s2058_s10 }
  0xa3   : > { %v319_v10 = vld [vmem:[%s2056_s29] sm:%s310_s11] (!%p1508_p2)  ;;  %v321_v11 = vld [vmem:[%s2056_s29 + $0x18] sm:%s310_s11] (!%p1508_p2) }
  0xa4   : > { %320 = vst [vmem:[%s2060_s15] sm:%s310_s11] (!%p1508_p2), %v319_v10  ;;  %322 = vst [vmem:[%s2060_s15 + $0x10] sm:%s310_s11] (!%p1508_p2), %v321_v11 }
  0xa9 PF: > { %p1509_p3 = scmp.ge.s32.totalorder %s1874_s14, 1  ;;  %p726_p4 = scmp.lt.s32.totalorder %s1874_s14, 3 }
  0xab   : > { %p727_p5 = pnand %p1509_p3, %p726_p4 }
  0xac   : > { %s1512_s17 = sshll.u32 (!%p727_p5), %s2021_s8, 1  ;;  %v1942_v12 = vmov (!%p727_p5), 0.0   ;;  %s2350_s29 = sand.u32 (!%p727_p5), 1, %s1866_s12   ;;  %v1943_v13 = vmov (!%p727_p5), 0   ;;  %v1027_v14 = vld [vmem:[%s2493_s4] sm:$0xff] (!%p727_p5)  ;;  %v1029_v15 = vld [vmem:[%s2493_s4 + $0x10] sm:$0xff] (!%p727_p5) }
  0xad   : > { %730 = sbr.rel (%p727_p5) target bundleno = 909 (0x38d), region = 118  ;;  %p787_p7 = scmp.lt.s32.totalorder (!%p727_p5), %s1512_s17, 2  ;;  %894 = vmatprep.mubr.f32.mxu0 (!%p727_p5), %v1942_v12  ;;  %1172 = vmatprep.mubr.f32.mxu1 (!%p727_p5), %v1942_v12  ;;  %v1028_v16 = vld [vmem:[%s2493_s4 + $0x8] sm:$0xff] (!%p727_p5)  ;;  %v1030_v19 = vld [vmem:[%s2493_s4 + $0x18] sm:$0xff] (!%p727_p5)  ;;  %vm825_vm0 = vcmask (!%p727_p5), 1043456   ;;  %v805_v25 = vld [vmem:[%s2492_s3] sm:$0xff] (!%p727_p5) }
  0xae   : > { %s1510_s10 = sshll.u32 (!%p727_p5), %s2350_s29, 5  ;;  %1745 = vset.pattern.permute.xlu0 (!%p727_p5), %v1943_v13  ;;  %1746 = vset.pattern.permute.xlu1 (!%p727_p5), %v1943_v13  ;;  %vm812_vm1 = vcmask (!%p727_p5), 31744   ;;  %vm1944_vm2 = vmmov (!%p727_p5), 1   ;;  %v1071_v27 = vld [vmem:[%s2495_s6] sm:$0xff] (!%p727_p5)  ;;  %v1072_v28 = vld [vmem:[%s2495_s6 + $0x8] sm:$0xff] (!%p727_p5)  ;;  %v1073_v30 = vld [vmem:[%s2495_s6 + $0x10] sm:$0xff] (!%p727_p5) }
  0xaf   : > { %1033 = vperm.xlu0 (!%p727_p5), %1745, %v1027_v14   ;;  %1043 = vperm.xlu1 (!%p727_p5), %1746, %v1029_v15   ;;  %s735_s26 = scalar_lea.vmem (!%p727_p5), [#allocation3], %s1510_s10  ;;  %vm1543_vm3 = vmpackc.low (!%p727_p5), %vm825_vm0, %vm1944_vm2  ;;  %v806_v29 = vld [vmem:[%s2492_s3 + $0x8] sm:$0xff] (!%p727_p5)  ;;  %v1074_v31 = vld [vmem:[%s2495_s6 + $0x18] sm:$0xff] (!%p727_p5)  ;;  %vm919_vm4 = vcmask (!%p727_p5), 97280   ;;  %vm1095_vm5 = vcmask (!%p727_p5), 261120   ;;  %s1206_s21 = sld [smem:[#allocation2]] (!%p727_p5) }
  0xb0   : > { %v802_v17 = vld [vmem:[%s735_s26 + $0x8] sm:$0xff] (!%p727_p5)  ;;  %v804_v18 = vld [vmem:[%s735_s26 + $0x18] sm:$0xf] (!%p727_p5)  ;;  %v801_v20 = vld [vmem:[%s735_s26] sm:$0xff] (!%p727_p5)  ;;  %s1541_s16 = sshll.u32 (!%p727_p5), %s2021_s8, 5  ;;  %s1306_s24 = scalar_lea.sflag (!%p727_p5), [#allocation5], %s2350_s29 }
  0xb1   : > { %v803_v21 = vld [vmem:[%s735_s26 + $0x10] sm:$0xf] (!%p727_p5)  ;;  %v1542_v24 = vpack.c.bf16 (!%p727_p5), %v804_v18, %v802_v17  ;;  %v808_v33 = vld [vmem:[%s2492_s3 + $0x18] sm:$0xff] (!%p727_p5)  ;;  %v797_v34 = vld [vmem:[%s2491_s2] sm:$0xff] (!%p727_p5)  ;;  %s2445_s15 = scalar_lea.hbm (!%p727_p5), %s2498_s9, %s1541_s16  ;;  %s1946_s8 = smov (!%p727_p5), [#allocation4]  }
  0xb2   : > { %v1545_v26 = vpack.c.bf16 (!%p727_p5), %v803_v21, %v801_v20  ;;  %v807_v32 = vld [vmem:[%s2492_s3 + $0x10] sm:$0xff] (!%p727_p5)  ;;  %v798_v35 = vld [vmem:[%s2491_s2 + $0x8] sm:$0xff] (!%p727_p5)  ;;  %v800_v37 = vld [vmem:[%s2491_s2 + $0x18] sm:$0xff] (!%p727_p5)  ;;  %s1752_s18 = sshll.u32 (!%p727_p5), %s1946_s8, 4  ;;  %s1753_s18 = int_to_ptr.vmem [resolvable:$false] %s1752_s18 }
  0xb3   : > { %1038 = vperm.xlu0 (!%p727_p5), %1745, %v1028_v16   ;;  %1048 = vperm.xlu1 (!%p727_p5), %1746, %v1030_v19   ;;  %v799_v36 = vld [vmem:[%s2491_s2 + $0x10] sm:$0xff] (!%p727_p5)  ;;  %v1067_v6 = vld [vmem:[%s2494_s5] sm:$0xff] (!%p727_p5)  ;;  %v1068_v7 = vld [vmem:[%s2494_s5 + $0x8] sm:$0xff] (!%p727_p5)  ;;  %s1754_s23 = scalar_lea.vmem (!%p727_p5), %s1753_s18, 64 }
  0xb4   : > { %s2541_s17 = smov (!%p787_p7, %s1512_s17), 2  ;;  %v1069_v8 = vld [vmem:[%s2494_s5 + $0x10] sm:$0xff]  ;;  %v1070_v9 = vld [vmem:[%s2494_s5 + $0x18] sm:$0xff] }
  0xb5   : > { %s1513_s30 = sshll.u32 %s2541_s17, 2 }
  0xb6   : > { %s790_s27 = scalar_lea.vmem %s2490_s1, %s1513_s30 }
  0xb7   : > { %v809_v22 = vld [vmem:[%s790_s27] sm:$0xff]  ;;  %1077 = vperm.xlu0 %1745, %v1071_v27   ;;  %1082 = vperm.xlu1 %1746, %v1072_v28   ;;  %s1511_s27 = sshll.u32 %s2350_s29, 1 }
  0xb8   : > { %v811_v23 = vcombine.high %v809_v22, %v809_v22  ;;  %s776_s28 = scalar_lea.vmem [#allocation4], %s1511_s27 }
  0xb9   : > { %s1320_s11 = sshll.u32 %s776_s28, 4  ;;  %s2447_s11 = int_to_ptr.vmem [resolvable:$true] %s1320_s11 }
  0xba   : > { %1514 = vmatprep.subr.msk.mxu0 %vm825_vm0, %v811_v23  ;;  %s1748_s25 = scalar_lea.vmem %s2447_s11, 32  ;;  %p1755_p13 = scmp.lt.s32.totalorder %s2447_s11, %s1753_s18 }
  0xbb   : > { %1515 = vmatpush1.msk.msra.mxu0 %vm825_vm0, %v809_v22  ;;  %1087 = vperm.xlu0 %1745, %v1073_v30   ;;  %p1749_p10 = scmp.ne.s32.totalorder %s2447_s11, %s1748_s25  ;;  %p1756_p0 = scmp.lt.s32.totalorder %s1754_s23, %s1748_s25 }
  0xbc   : > { %1516 = vmatmul.mubr.msk.f32.vlgmr.msra.gmra.mrb[0].mxu0 %vm812_vm1, %v805_v25  ;;  %1544 = vmatprep.subr.msk.bf16.mxu0 %vm1543_vm3, %v1542_v24 }
  0xbd   : > { %900 = vmatprep.mubr.f32.mxu0 %v1942_v12  ;;  %1547 = vmatpush1.bf16.msk.msra.mxu0 %vm1543_vm3, %v1545_v26  ;;  %p1750_p11 = pnand %p1749_p10, %p2039_p6  ;;  %p1757_p1 = por %p1756_p0, %p1755_p13 }
  0xbe   : > { %1092 = vperm.xlu1 %1746, %v1074_v31  }
  0xbf   : > { %p1751_p12 = pneg %p1750_p11 }
  0xc0   : > { %1517 = vmatmul.mubr.msk.f32.gmra.mrb[2].mxu0 %vm812_vm1, %v806_v29 }
  0xc1   : > { %906 = vmatprep.mubr.f32.mxu0 %v1942_v12  ;;  %p1758_p2 = pnand %p1757_p1, %p1751_p12 }
  0xc4   : > { %1518 = vmatmul.mubr.msk.f32.gmra.mrb[4].mxu0 %vm812_vm1, %v807_v32 }
  0xc5   : > { %912 = vmatprep.mubr.f32.mxu0 %v1942_v12 }
  0xc8   : > { %1519 = vmatmul.mubr.msk.f32.gmra.mrb[6].mxu0 %vm812_vm1, %v808_v33 }
  0xc9   : > { %1002 = vmatprep.mubr.f32.mxu0 %v1942_v12 }
  0xcc   : > { %1522 = vmatmul.mubr.msk.f32.vlgmr.msra.gmra.mrb[0].mxu0 %vm919_vm4, %v797_v34 }
  0xcd   : > { %1008 = vmatprep.mubr.f32.mxu0 %v1942_v12 }
  0xd0   : > { %1523 = vmatmul.mubr.msk.f32.gmra.mrb[2].mxu0 %vm919_vm4, %v798_v35 }
  0xd1   : > { %1014 = vmatprep.mubr.f32.mxu0 %v1942_v12 }
  0xd4   : > { %1524 = vmatmul.mubr.msk.f32.gmra.mrb[4].mxu0 %vm919_vm4, %v799_v36 }
  0xd5   : > { %1020 = vmatprep.mubr.f32.mxu0 %v1942_v12 }
  0xd8   : > { %1525 = vmatmul.mubr.msk.f32.gmra.mrb[6].mxu0 %vm919_vm4, %v800_v37 }
 0x12e   : > { %v1034_v38 = vpop.permute.xlu0 %1033  ;;  %v1044_v47 = vpop.permute.xlu1 %1043 }
 0x132   : > { %v1039_v42 = vpop.permute.xlu0 %1038  ;;  %v1049_v58 = vpop.permute.xlu1 %1048 }
 0x136   : > { %v1078_v13 = vpop.permute.xlu0 %1077  ;;  %v1083_v15 = vpop.permute.xlu1 %1082 }
 0x13a   : > { %v1088_v28 = vpop.permute.xlu0 %1087 }
 0x13d   : > { %v1093_v30 = vpop.permute.xlu1 %1092 }
 0x19f   : > { %v1004_v39 = vpop.f32.mrb[0].mxu0 }
 0x1a0   : > { %v1006_v40 = vpop.f32.mrb[1].mxu0  ;;  %v1051_v41 = vadd.f32 %v1034_v38, %v1004_v39 }
 0x1a1   : > { %v1052_v43 = vadd.f32 %v1034_v38, %v1006_v40 }
 0x1a2   : > { %v1059_v49 = vmax.f32 %v1051_v41, 0.0 }
 0x1a3   : > { %v1010_v44 = vpop.f32.mrb[2].mxu0  ;;  %v1060_v51 = vmax.f32 %v1052_v43, 0.0  ;;  %v1945_v43 = vmov 1966171168  }
 0x1a4   : > { %v1053_v45 = vadd.f32 %v1039_v42, %v1010_v44  ;;  %v1012_v46 = vpop.f32.mrb[3].mxu0  ;;  %v1286_v44 = vunpack.c.l.s4 %v1945_v43 }
 0x1a5   : > { %v1054_v48 = vadd.f32 %v1039_v42, %v1012_v46  ;;  %v1205_v42 = vld [vmem:[%s2496_s7] sm:$0x1]  ;;  %v1207_v46 = vstv %s1206_s21 }
 0x1a6   : > { %v1061_v50 = vmax.f32 %v1053_v45, 0.0  ;;  %v1288_v45 = vlaneseq }
 0x1a7   : > { %v1062_v52 = vmax.f32 %v1054_v48, 0.0  ;;  %v1016_v53 = vpop.f32.mrb[4].mxu0 }
 0x1a8   : > { %v1018_v54 = vpop.f32.mrb[5].mxu0  ;;  %v1550_v55 = vpack.c.bf16 %v1061_v50, %v1059_v49  ;;  %v1055_v57 = vadd.f32 %v1044_v47, %v1016_v53  ;;  %v1289_v48 = vshrl.u32 %v1288_v45, 7  ;;  %vm1302_vm6 = vcmp.lt.s32.totalorder %v1288_v45, 256 }
 0x1a9   : > { %v1548_v56 = vpack.c.bf16 %v1062_v52, %v1060_v51  ;;  %v1056_v59 = vadd.f32 %v1044_v47, %v1018_v54  ;;  %v1287_v47 = vunpack.c.0.s8 %v1286_v44 }
 0x1aa   : > { %v1063_v0 = vmax.f32 %v1055_v57, 0.0 }
 0x1ab   : > { %v1022_v60 = vpop.f32.mrb[6].mxu0  ;;  %1549 = vmatprep.subr.bf16.mxu1 %v1548_v56  ;;  %v1064_v2 = vmax.f32 %v1056_v59, 0.0  ;;  %v1290_v53 = vsub.s32 %v1287_v47, %v1289_v48 }
 0x1ac   : > { %v1057_v61 = vadd.f32 %v1049_v58, %v1022_v60  ;;  %v1024_v62 = vpop.f32.mrb[7].mxu0  ;;  %1551 = vmatpush1.bf16.msra.mxu1 %v1550_v55 }
 0x1ad   : > { %v1058_v63 = vadd.f32 %v1049_v58, %v1024_v62 }
 0x1ae   : > { %v1065_v1 = vmax.f32 %v1057_v61, 0.0 }
 0x1af   : > { %v1066_v3 = vmax.f32 %v1058_v63, 0.0 }
 0x1b0   : > { %v1554_v4 = vpack.c.bf16 %v1065_v1, %v1063_v0 }
 0x1b1   : > { %v1552_v5 = vpack.c.bf16 %v1066_v3, %v1064_v2 }
 0x1b3   : > { %1553 = vmatprep.subr.bf16.mxu1 %v1552_v5 }
 0x1b4   : > { %1555 = vmatpush1.bf16.msra.mxu1 %v1554_v4 }
 0x1b7   : > { %1526 = vmatmul.mubr.msk.f32.vlgmr.msra.gmra.mrb[0].mxu1 %vm1095_vm5, %v1067_v6 }
 0x1b8   : > { %1178 = vmatprep.mubr.f32.mxu1 %v1942_v12 }
 0x1bb   : > { %1527 = vmatmul.mubr.msk.f32.gmra.mrb[2].mxu1 %vm1095_vm5, %v1068_v7 }
 0x1bc   : > { %1184 = vmatprep.mubr.f32.mxu1 %v1942_v12 }
 0x1bf   : > { %1528 = vmatmul.mubr.msk.f32.gmra.mrb[4].mxu1 %vm1095_vm5, %v1069_v8 }
 0x1c0   : > { %1190 = vmatprep.mubr.f32.mxu1 %v1942_v12 }
 0x1c3   : > { %1529 = vmatmul.mubr.msk.f32.gmra.mrb[6].mxu1 %vm1095_vm5, %v1070_v9 }
 0x1c4   : > { %1275 = vmatprep.mubr.f32.mxu1 %v1942_v12 }
 0x28a   : > { %v1174_v10 = vpop.f32.mrb[0].mxu1 }
 0x28b   : > { %v1176_v11 = vpop.f32.mrb[1].mxu1  ;;  %v1175_v14 = vadd.f32 %v1174_v10, %v1078_v13 }
 0x28c   : > { %v1177_v16 = vadd.f32 %v1176_v11, %v1078_v13 }
 0x28d   : > { %v1197_v21 = vmax.f32 %v1175_v14, 0.0 }
 0x28e   : > { %v1180_v17 = vpop.f32.mrb[2].mxu1  ;;  %v1198_v23 = vmax.f32 %v1177_v16, 0.0 }
 0x28f   : > { %v1181_v18 = vadd.f32 %v1180_v17, %v1083_v15  ;;  %v1182_v19 = vpop.f32.mrb[3].mxu1 }
 0x290   : > { %v1183_v20 = vadd.f32 %v1182_v19, %v1083_v15 }
 0x291   : > { %v1199_v22 = vmax.f32 %v1181_v18, 0.0 }
 0x292   : > { %v1200_v24 = vmax.f32 %v1183_v20, 0.0  ;;  %v1186_v25 = vpop.f32.mrb[4].mxu1 }
 0x293   : > { %v1558_v26 = vpack.c.bf16 %v1199_v22, %v1197_v21  ;;  %v1188_v27 = vpop.f32.mrb[5].mxu1  ;;  %v1187_v12 = vadd.f32 %v1186_v25, %v1088_v28 }
 0x294   : > { %v1556_v29 = vpack.c.bf16 %v1200_v24, %v1198_v23  ;;  %v1189_v31 = vadd.f32 %v1188_v27, %v1088_v28 }
 0x295   : > { %v1201_v36 = vmax.f32 %v1187_v12, 0.0 }
 0x296   : > { %v1192_v32 = vpop.f32.mrb[6].mxu1  ;;  %1557 = vmatprep.subr.bf16.mxu1 %v1556_v29  ;;  %v1202_v38 = vmax.f32 %v1189_v31, 0.0 }
 0x297   : > { %v1193_v33 = vadd.f32 %v1192_v32, %v1093_v30  ;;  %v1194_v34 = vpop.f32.mrb[7].mxu1  ;;  %1559 = vmatpush1.bf16.msra.mxu1 %v1558_v26 }
 0x298   : > { %v1195_v35 = vadd.f32 %v1194_v34, %v1093_v30 }
 0x299   : > { %v1203_v37 = vmax.f32 %v1193_v33, 0.0 }
 0x29a   : > { %v1204_v39 = vmax.f32 %v1195_v35, 0.0 }
 0x29b   : > { %v1562_v40 = vpack.c.bf16 %v1203_v37, %v1201_v36 }
 0x29c   : > { %v1560_v41 = vpack.c.bf16 %v1204_v39, %v1202_v38 }
 0x29e   : > { %1561 = vmatprep.subr.bf16.mxu1 %v1560_v41 }
 0x29f   : > { %1563 = vmatpush1.bf16.msra.mxu1 %v1562_v40 }
 0x2a2   : > { %1530 = vmatmul.mubr.msk.f32.vlgmr.msra.gmra.mrb[8].mxu1 %vm1095_vm5, %v1205_v42 }
 0x375   : > { %v1277_v49 = vpop.f32.mrb[8].mxu1 }
 0x376   : > { %v1278_v50 = vadd.f32 %v1277_v49, %v1207_v46  ;;  %v1279_v51 = vpop.f32.mrb[9].mxu1 }
 0x377   : > { %v1280_v52 = vadd.f32 %v1279_v51, %v1207_v46 }
 0x379   : > { %v1284_v54 = vcombine.low %v1278_v50, %v1280_v52 }
 0x37b   : > { %v1291_v55 = vrot.slane %v1284_v54, %v1290_v53 }
 0x37d   : > { %v1298_v56 = vrot.slane %v1291_v55, %v1290_v53 }
 0x37f   : > { %1304 = vst.msk [vmem:[%s776_s28] sm:$0x3] %vm1302_vm6, %v1298_v56 }
 0x380   : > { %1761 = shalt.err (!%p1758_p2)
}
 0x381   : > { %s1762_s29 = scalar_lea.hbm %s2445_s15, 32  ;;  %s1766_s26 = scalar_lea.hbm %s2498_s9, 64 }
 0x382   : > { %p1763_p3 = scmp.ne.s32.totalorder %s2445_s15, %s1762_s29  ;;  %p1767_p7 = scmp.lt.u32.totalorder %s2445_s15, %s2498_s9 }
 0x383   : > { %p1768_p10 = scmp.lt.u32.totalorder %s1766_s26, %s1762_s29  ;;  %p1770_p12 = scmp.lt.u32.totalorder %s1762_s29, %s2445_s15 }
 0x384   : > { %p1764_p4 = pnand %p1763_p3, %p2039_p6 }
 0x385   : > { %p1769_p11 = por %p1768_p10, %p1767_p7 }
 0x386   : > { %p1765_p5 = pneg %p1764_p4 }
 0x387   : > { %p1771_p13 = por %p1770_p12, %p1769_p11 }
 0x389   : > { %p1772_p0 = pnand %p1771_p13, %p1765_p5 }
 0x38b   : > { %1775 = shalt.err (!%p1772_p0)
}
 0x38c   : > { %1572 = dma.vmem_to_hbm [thread:$0]  (%p2039_p6), %s2447_s11, 32, %s2445_s15, %s1306_s24  }
 0x38d PF: > { %s2523_s22 = sld [smem:[#allocation7_spill]]  ;;  %p1575_p1 = pnand %p1481_p9, %p2043_p8 }
 0x393   : > { %s1332_s27 = sand.u32 1, %s2523_s22  }
 0x394   : > { %s1333_s16 = scalar_lea.sflag [#allocation5], %s1332_s27 }
 0x395   : > { %1857 = dma.done.wait (!%p1575_p1), %s1333_s16, 32  }
 0x396   : > { %1859 = vsyncadd (!%p1575_p1), %s1333_s16, 4294967264  ;;  %s2525_s14 = sld [smem:[#allocation9_spill]]  ;;  %s2526_s28 = sld [smem:[#allocation8_spill]] }
 0x397   : > { %s2527_s13 = sld [smem:[#allocation10_spill]]  ;;  %s2528_s11 = smov %s1866_s12 }
 0x39c   : > { %p20_p2 = scmp.ge.s32.totalorder %s2525_s14, 4   ;;  %s2529_s12 = smov %s2526_s28 }
 0x39e   :  { %22 = sbr.rel (!%p20_p2) target bundleno = 6 (0x6), region = 227 }
 0x3a5   :  { %1338 = vsyncpa [#allocation5], 1 }
 0x3a6   :  { %1340 = vsyncpa [#allocation5 + $0x1], 1 }

</bundles_post_ra>
